<compile_context>
chip_gen: v7x
topology: tpu7x:2x2x1
jax: 0.10.0
libtpu: 0.0.40
codegen_flags: <defaults>
</compile_context>

<pallas_src>
import functools
import math

import jax
import jax.numpy as jnp
from jax.experimental import pallas as pl
from jax.experimental.pallas import tpu as pltpu


_MASK_VALUE = -1e30          # big finite negative; avoids inf-inf -> NaN pitfalls


def _compute_vmem_limit():
    """Generation-aware scoped VMEM limit (v7x: 64 MiB physical; v5e/v6e: 128 MiB)."""
    try:
        cap = int(pltpu.get_tpu_info().vmem_capacity_bytes)
    except Exception:
        cap = 64 * 1024 * 1024
    return max(32 * 1024 * 1024, min((cap * 3) // 4, 96 * 1024 * 1024))


_VMEM_LIMIT = _compute_vmem_limit()


def _pick_tile(dim, candidates):
    """Largest candidate dividing dim, else the full dim (always BlockSpec-legal)."""
    for c in candidates:
        if dim % c == 0:
            return c
    return dim


def _heads_per_group(n_head, head_dim):
    """Largest divisor of n_head whose lane width (hpg*head_dim) is <= 128."""
    if head_dim >= 128:
        return 1
    best = 1
    for hpg in range(1, n_head + 1):
        if n_head % hpg == 0 and hpg * head_dim <= 128:
            best = hpg
    return best


# ---------------------------------------------------------------------------
# Kernel 1: tiled dense layer  o = x @ W + b
# ---------------------------------------------------------------------------
def _linear_kernel(x_ref, w_ref, b_ref, o_ref):
    acc = jnp.dot(x_ref[...], w_ref[...], preferred_element_type=jnp.float32)
    o_ref[...] = (acc + b_ref[...]).astype(o_ref.dtype)


def _linear_acc_kernel(x_ref, w_ref, b_ref, o_ref, acc_ref):
    @pl.when(pl.program_id(2) == 0)
    def _init():
        acc_ref[...] = jnp.zeros_like(acc_ref)

    acc_ref[...] += jnp.dot(x_ref[...], w_ref[...], preferred_element_type=jnp.float32)

    @pl.when(pl.program_id(2) == pl.num_programs(2) - 1)
    def _finalize():
        o_ref[...] = (acc_ref[...] + b_ref[...]).astype(o_ref.dtype)


def pallas_linear(x2d, w, b, *, out_dtype=None):
    """o = x2d @ w + b, tiled over (M, N[, K])."""
    M, K = x2d.shape
    K2, N = w.shape
    assert K == K2 and b.shape == (N,)
    out_dtype = x2d.dtype if out_dtype is None else jnp.dtype(out_dtype)
    in_b = jnp.dtype(x2d.dtype).itemsize
    out_b = jnp.dtype(out_dtype).itemsize
    b2d = b.astype(jnp.float32).reshape(1, N)

    tn = _pick_tile(N, (512, 256, 128))

    if K <= 2048:
        # Single K block (the nanoGPT case): no f32 scratch, no init/finalize pl.when.
        tm = None
        for cand in (2048, 1024, 512, 256, 128):      # big M tiles cut weight re-reads
            if M % cand == 0:
                vmem = 2 * (cand * K * in_b + K * tn * in_b + cand * tn * out_b)
                if vmem <= 28 * 1024 * 1024:
                    tm = cand
                    break
        if tm is None:
            tm = _pick_tile(M, (512, 256, 128))
        grid = (M // tm, N // tn)
        cost = pl.CostEstimate(
            flops=int(2 * M * K * N), transcendentals=0,
            bytes_accessed=int(M * K * in_b + (M // tm) * K * N * in_b
                               + M * N * out_b + N * 4))
        return pl.pallas_call(
            _linear_kernel,
            out_shape=jax.ShapeDtypeStruct((M, N), out_dtype),
            grid_spec=pltpu.PrefetchScalarGridSpec(
                num_scalar_prefetch=0,
                grid=grid,
                in_specs=[
                    pl.BlockSpec((tm, K), lambda i, j: (i, 0)),
                    pl.BlockSpec((K, tn), lambda i, j: (0, j)),
                    pl.BlockSpec((1, tn), lambda i, j: (0, j)),
                ],
                out_specs=pl.BlockSpec((tm, tn), lambda i, j: (i, j)),
            ),
            compiler_params=pltpu.CompilerParams(
                dimension_semantics=("parallel", "parallel"),
                vmem_limit_bytes=_VMEM_LIMIT),
            cost_estimate=cost,
        )(x2d, w, b2d)

    # Large-K fallback: K grid axis last ("arbitrary") + resident f32 accumulator.
    tk = _pick_tile(K, (1024, 512, 256))
    tm = None
    for cand in (1024, 512, 256, 128):
        if M % cand == 0:
            vmem = (2 * (cand * tk * in_b + tk * tn * in_b + cand * tn * out_b)
                    + cand * tn * 4)
            if vmem <= 28 * 1024 * 1024:
                tm = cand
                break
    if tm is None:
        tm = _pick_tile(M, (256, 128))
    grid = (M // tm, N // tn, K // tk)
    cost = pl.CostEstimate(
        flops=int(2 * M * K * N), transcendentals=0,
        bytes_accessed=int(M * K * in_b + (M // tm) * K * N * in_b
                           + M * N * out_b + N * 4))
    return pl.pallas_call(
        _linear_acc_kernel,
        out_shape=jax.ShapeDtypeStruct((M, N), out_dtype),
        grid_spec=pltpu.PrefetchScalarGridSpec(
            num_scalar_prefetch=0,
            grid=grid,
            in_specs=[
                pl.BlockSpec((tm, tk), lambda i, j, kk: (i, kk)),
                pl.BlockSpec((tk, tn), lambda i, j, kk: (kk, j)),
                pl.BlockSpec((1, tn), lambda i, j, kk: (0, j)),
            ],
            out_specs=pl.BlockSpec((tm, tn), lambda i, j, kk: (i, j)),
            scratch_shapes=[pltpu.VMEM((tm, tn), jnp.float32)],
        ),
        compiler_params=pltpu.CompilerParams(
            dimension_semantics=("parallel", "parallel", "arbitrary"),
            vmem_limit_bytes=_VMEM_LIMIT),
        cost_estimate=cost,
    )(x2d, w, b2d)


# ---------------------------------------------------------------------------
# Kernel 2: flash-style causal attention, heads packed along the last dim
# ---------------------------------------------------------------------------
def _flash_attn_kernel(q_ref, k_ref, v_ref, o_ref, m_sc, l_sc, acc_sc, *,
                       head_dim, heads_per_group, n_groups, tq, tk, r, approx_recip):
    qi = pl.program_id(1)
    ki = pl.program_id(2)
    n_kv = pl.num_programs(2)
    gw = heads_per_group * head_dim          # lane width of one head group (aligned)

    @pl.when(ki == 0)
    def _init():
        m_sc[...] = jnp.full_like(m_sc, -jnp.inf)
        l_sc[...] = jnp.zeros_like(l_sc)
        acc_sc[...] = jnp.zeros_like(acc_sc)

    def step(masked):
        if masked:
            rows = qi * tq + jax.lax.broadcasted_iota(jnp.int32, (tq, tk), 0)
            cols = ki * tk + jax.lax.broadcasted_iota(jnp.int32, (tq, tk), 1)
            causal = cols <= rows
        if heads_per_group > 1:
            band = jax.lax.broadcasted_iota(jnp.int32, (1, gw), 1) // head_dim

        for g in range(n_groups):
            lo = g * gw
            # 128-lane-aligned ref slices: no lane rotates in the hot loop.
            qg = q_ref[0, :, lo:lo + gw]
            kg = k_ref[0, :, lo:lo + gw]
            vg = v_ref[0, :, lo:lo + gw]

            pv = None
            alpha_g = None
            for j in range(heads_per_group):
                h = g * heads_per_group + j
                if heads_per_group > 1:
                    sel = band == j
                    kh = jnp.where(sel, kg, jnp.zeros_like(kg))
                    vh = jnp.where(sel, vg, jnp.zeros_like(vg))
                else:
                    kh, vh = kg, vg
                # QK^T contracting last dims (MXU-native transposed RHS). Lanes of other
                # heads are zeroed in kh, so the full-width contraction is exact per head.
                s = jax.lax.dot_general(qg, kh, (((1,), (1,)), ((), ())),
                                        preferred_element_type=jnp.float32)  # (tq, tk)
                if masked:
                    s = jnp.where(causal, s, _MASK_VALUE)
                m_prev = m_sc[h]
                m_new = jnp.maximum(m_prev, jnp.max(s, axis=-1, keepdims=True))
                alpha = jnp.exp(m_prev - m_new)                               # (tq, 1)
                p = jnp.exp(s - m_new)                                        # (tq, tk)
                l_sc[h] = alpha * l_sc[h] + jnp.sum(p, axis=-1, keepdims=True)
                m_sc[h] = m_new
                pv_h = jnp.dot(p.astype(vh.dtype), vh,
                               preferred_element_type=jnp.float32)            # (tq, gw)
                pv = pv_h if pv is None else pv + pv_h
                if heads_per_group > 1:
                    base = (alpha_g if alpha_g is not None
                            else jnp.zeros((tq, gw), jnp.float32))
                    alpha_g = jnp.where(sel, alpha, base)
                else:
                    alpha_g = alpha
            # single aligned, unmasked read-modify-write per group per kv step
            acc_sc[:, lo:lo + gw] = alpha_g * acc_sc[:, lo:lo + gw] + pv

    kv_last = (qi + 1) * r - 1          # last kv tile touching this q tile (causal)
    compute = ki <= kv_last
    on_diag = ki >= qi * r              # kv tile intersects the causal diagonal

    @pl.when(compute & on_diag)
    def _diag():
        step(masked=True)

    @pl.when(compute & (ki < qi * r))
    def _interior():
        step(masked=False)

    @pl.when(ki == n_kv - 1)
    def _finalize():
        if heads_per_group > 1:
            band = jax.lax.broadcasted_iota(jnp.int32, (1, gw), 1) // head_dim
        for g in range(n_groups):
            lo = g * gw
            if heads_per_group > 1:
                inv_g = jnp.zeros((tq, gw), jnp.float32)
                for j in range(heads_per_group):
                    h = g * heads_per_group + j
                    inv_g = jnp.where(band == j,
                                      pl.reciprocal(l_sc[h], approx=approx_recip),
                                      inv_g)
            else:
                inv_g = pl.reciprocal(l_sc[g], approx=approx_recip)
            o_ref[0, :, lo:lo + gw] = (acc_sc[:, lo:lo + gw] * inv_g).astype(o_ref.dtype)


def pallas_causal_flash_attention(qkv, *, n_head, approx_recip=True):
    """qkv: (B, T, 3C), heads packed along the last dim (C = n_head * D). Returns (B, T, C)."""
    B, T, C3 = qkv.shape
    assert C3 % 3 == 0
    C = C3 // 3
    assert C % n_head == 0
    head_dim = C // n_head

    if T % 128 == 0:
        tk = 128
        tq = 256 if T % 256 == 0 else 128
    else:
        if T > 1024:
            raise ValueError("pad T to a multiple of 128 for long sequences")
        tq = tk = T
    r = tq // tk
    n_q, n_kv = T // tq, T // tk
    hpg = _heads_per_group(n_head, head_dim)
    n_groups = n_head // hpg

    kernel = functools.partial(
        _flash_attn_kernel, head_dim=head_dim, heads_per_group=hpg, n_groups=n_groups,
        tq=tq, tk=tk, r=r, approx_recip=approx_recip)

    # Clamp the kv block index so skipped upper-triangle tiles are never re-DMA'd.
    def kv_block(iq, ik):
        return jnp.minimum(ik, (iq + 1) * r - 1)

    itemsize = jnp.dtype(qkv.dtype).itemsize
    kv_tiles_read = sum(min((iq + 1) * r, n_kv) for iq in range(n_q))
    cost = pl.CostEstimate(
        flops=int(2 * B * T * T * C),                       # causal ~half of dense 4BTTC
        transcendentals=int(B * n_head * T * T // 2),
        bytes_accessed=int(B * itemsize * (2 * T * C + 2 * kv_tiles_read * tk * C)))

    out_spec = pl.BlockSpec((1, tq, C), lambda b, iq, ik: (b, iq, 0))
    scratch = [pltpu.VMEM((n_head, tq, 1), jnp.float32),    # running max m
               pltpu.VMEM((n_head, tq, 1), jnp.float32),    # running sum l
               pltpu.VMEM((tq, C), jnp.float32)]            # output accumulator

    if C % 128 == 0:
        # Fast path: read q/k/v straight out of the packed qkv (no jnp.split round trip).
        in_specs = [
            pl.BlockSpec((1, tq, C), lambda b, iq, ik: (b, iq, 0)),
            pl.BlockSpec((1, tk, C), lambda b, iq, ik: (b, kv_block(iq, ik), 1)),
            pl.BlockSpec((1, tk, C), lambda b, iq, ik: (b, kv_block(iq, ik), 2)),
        ]
        operands = (qkv, qkv, qkv)
    else:
        # Fallback for non-128-aligned C: last-dim blocks must equal the full dim.
        q, k, v = jnp.split(qkv, 3, axis=-1)
        in_specs = [
            pl.BlockSpec((1, tq, C), lambda b, iq, ik: (b, iq, 0)),
            pl.BlockSpec((1, tk, C), lambda b, iq, ik: (b, kv_block(iq, ik), 0)),
            pl.BlockSpec((1, tk, C), lambda b, iq, ik: (b, kv_block(iq, ik), 0)),
        ]
        operands = (q, k, v)

    # Megacore: with the causal skip, per-iq work is unbalanced; keep the split on the
    # balanced batch axis when B >= 2.
    iq_sem = "arbitrary" if B >= 2 else "parallel"

    return pl.pallas_call(
        kernel,
        out_shape=jax.ShapeDtypeStruct((B, T, C), qkv.dtype),
        grid_spec=pltpu.PrefetchScalarGridSpec(
            num_scalar_prefetch=0,
            grid=(B, n_q, n_kv),
            in_specs=in_specs,
            out_specs=out_spec,
            scratch_shapes=scratch,
        ),
        compiler_params=pltpu.CompilerParams(
            dimension_semantics=("parallel", iq_sem, "arbitrary"),
            vmem_limit_bytes=_VMEM_LIMIT),
        cost_estimate=cost,
    )(*operands)


# ---------------------------------------------------------------------------
# Module wrapper (forward pass of nanoGPT CausalSelfAttention)
# ---------------------------------------------------------------------------
def causal_self_attention(x, params, n_head, *, compute_dtype=None, approx_recip=True):
    """x: (B, T, C) -> (B, T, C). compute_dtype (e.g. bf16) controls matmul operand dtype."""
    B, T, C = x.shape
    assert C % n_head == 0
    head_dim = C // n_head
    cd = x.dtype if compute_dtype is None else jnp.dtype(compute_dtype)

    # Fold 1/sqrt(head_dim) into the Q columns of c_attn (exact; removes the per-kv-step
    # q scaling from the attention kernel).
    scale = 1.0 / math.sqrt(head_dim)
    col_scale = jnp.concatenate([jnp.full((C,), scale, jnp.float32),
                                 jnp.ones((2 * C,), jnp.float32)])
    w_attn = (params["w_attn"].astype(jnp.float32) * col_scale[None, :]).astype(cd)
    b_attn = params["b_attn"].astype(jnp.float32) * col_scale

    x2d = x.reshape(B * T, C).astype(cd)
    # qkv projection; q/k/v stay packed along the last dim -> no head transposes in HBM.
    qkv = pallas_linear(x2d, w_attn, b_attn, out_dtype=cd).reshape(B, T, 3 * C)

    y = pallas_causal_flash_attention(qkv, n_head=n_head, approx_recip=approx_recip)

    out = pallas_linear(y.reshape(B * T, C), params["w_proj"].astype(cd),
                        params["b_proj"], out_dtype=x.dtype)
    return out.reshape(B, T, C)


# ---------------------------------------------------------------------------
# Pure-JAX reference for correctness check
# ---------------------------------------------------------------------------
def reference(x, params, n_head):
    B, T, C = x.shape
    hd = C // n_head
    hp = jax.lax.Precision.HIGHEST
    qkv = jnp.dot(x, params["w_attn"], precision=hp) + params["b_attn"]
    q, k, v = jnp.split(qkv, 3, axis=2)
    q = q.reshape(B, T, n_head, hd).transpose(0, 2, 1, 3)
    k = k.reshape(B, T, n_head, hd).transpose(0, 2, 1, 3)
    v = v.reshape(B, T, n_head, hd).transpose(0, 2, 1, 3)
    s = jnp.einsum("bhqd,bhkd->bhqk", q, k, precision=hp) / jnp.sqrt(jnp.float32(hd))
    mask = jnp.tril(jnp.ones((T, T), dtype=bool))
    s = jnp.where(mask[None, None], s, -jnp.inf)
    p = jax.nn.softmax(s, axis=-1)
    y = jnp.einsum("bhqk,bhkd->bhqd", p, v, precision=hp)
    y = y.transpose(0, 2, 1, 3).reshape(B, T, C)
    return jnp.dot(y, params["w_proj"], precision=hp) + params["b_proj"]


if __name__ == "__main__":
    def make_inputs(key, B, T, C):
        kx, k1, k2, k3, k4 = jax.random.split(key, 5)
        x = jax.random.normal(kx, (B, T, C), dtype=jnp.float32)
        params = {
            "w_attn": jax.random.normal(k1, (C, 3 * C), dtype=jnp.float32) * 0.02,
            "b_attn": jax.random.normal(k2, (3 * C,), dtype=jnp.float32) * 0.02,
            "w_proj": jax.random.normal(k3, (C, C), dtype=jnp.float32) * 0.02,
            "b_proj": jax.random.normal(k4, (C,), dtype=jnp.float32) * 0.02,
        }
        return x, params

    # --- check 1: tiny shape (non-128-aligned C -> split fallback), exact reciprocal --
    B, T, C, H = 2, 8, 32, 4
    x, params = make_inputs(jax.random.PRNGKey(0), B, T, C)
    y = jax.block_until_ready(causal_self_attention(x, params, H, approx_recip=False))
    y_ref = reference(x, params, H)
    assert y.shape == (B, T, C)
    assert jnp.allclose(y, y_ref, atol=1e-3, rtol=1e-3), "f32 mismatch (tiny shape)"

    # --- check 2: multi-tile causal shape: fused qkv path, interior + diagonal +
    #     DMA-clamped skipped KV tiles, paired 128-lane head groups --------------------
    B2, T2, C2, H2 = 2, 512, 256, 4
    x2, params2 = make_inputs(jax.random.PRNGKey(0), B2, T2, C2)
    y2 = jax.block_until_ready(causal_self_attention(x2, params2, H2, approx_recip=False))
    y2_ref = reference(x2, params2, H2)
    assert jnp.allclose(y2, y2_ref, atol=1e-3, rtol=1e-3), "f32 mismatch (tiled shape)"

    # --- check 3: bf16 matmuls + approx reciprocal (production fast path) -------------
    y_bf16 = jax.block_until_ready(
        causal_self_attention(x2, params2, H2, compute_dtype=jnp.bfloat16))
    assert bool(jnp.all(jnp.isfinite(y_bf16))), "bf16 path produced non-finite values"
    assert jnp.allclose(y_bf16, y2_ref, atol=5e-2, rtol=5e-2), "bf16 path diverged"

    print("KERNEL_OK")
</pallas_src>

<mosaic_0001>
module attributes {stable_mosaic.version = 11 : i64} {
  func.func @_linear_kernel(%arg0: i32, %arg1: i32, %arg2: memref<16x32xf32, #tpu.memory_space<vmem>>, %arg3: memref<32x96xf32, #tpu.memory_space<vmem>>, %arg4: memref<1x96xf32, #tpu.memory_space<vmem>>, %arg5: memref<16x96xf32, #tpu.memory_space<vmem>>) attributes {dimension_semantics = [#tpu.dimension_semantics<parallel>, #tpu.dimension_semantics<parallel>], iteration_bounds = array<i64: 1, 1>, scalar_prefetch = 0 : i64, scratch_operands = 0 : i64, tpu.core_type = #tpu.core_type<tc>, window_params = [{transform_indices = @transform_0, window_bounds = array<i64: 16, 32>}, {transform_indices = @transform_1, window_bounds = array<i64: 32, 96>}, {transform_indices = @transform_2, window_bounds = array<i64: 1, 96>}, {transform_indices = @transform_3, window_bounds = array<i64: 16, 96>}]} {
    %c0 = arith.constant 0 : index
    %c0_0 = arith.constant 0 : index
    %0 = vector.load %arg2[%c0, %c0_0] : memref<16x32xf32, #tpu.memory_space<vmem>>, vector<16x32xf32>
    %c0_1 = arith.constant 0 : index
    %c0_2 = arith.constant 0 : index
    %1 = vector.load %arg3[%c0_1, %c0_2] : memref<32x96xf32, #tpu.memory_space<vmem>>, vector<32x96xf32>
    %cst = arith.constant dense<0.000000e+00> : vector<16x96xf32>
    %2 = tpu.matmul %0, %1, %cst {dimension_numbers = #tpu.dot_dimension_numbers<[1], [0], [0], [1], [0, 0, 1, 1], [], []>} : vector<16x32xf32>, vector<32x96xf32>, vector<16x96xf32> -> vector<16x96xf32>
    %c0_3 = arith.constant 0 : index
    %c0_4 = arith.constant 0 : index
    %3 = vector.load %arg4[%c0_3, %c0_4] : memref<1x96xf32, #tpu.memory_space<vmem>>, vector<1x96xf32>
    %4 = vector.broadcast %3 : vector<1x96xf32> to vector<16x96xf32>
    %5 = arith.addf %2, %4 : vector<16x96xf32>
    %c0_5 = arith.constant 0 : index
    %c0_6 = arith.constant 0 : index
    %6 = vector.load %arg5[%c0_5, %c0_6] : memref<16x96xf32, #tpu.memory_space<vmem>>, vector<16x96xf32>
    tpu.vector_store %arg5[%c0_5, %c0_6], %5 {strides = array<i32>} : memref<16x96xf32, #tpu.memory_space<vmem>>, vector<16x96xf32>,
    return
  }
  func.func @transform_0(%arg0: i32, %arg1: i32) -> (i32, i32) {
    %c0_i32 = arith.constant 0 : i32
    %c0_i32_0 = arith.constant 0 : i32
    return %arg0, %c0_i32 : i32, i32
  }
  func.func @transform_1(%arg0: i32, %arg1: i32) -> (i32, i32) {
    %c0_i32 = arith.constant 0 : i32
    %c0_i32_0 = arith.constant 0 : i32
    return %c0_i32, %arg1 : i32, i32
  }
  func.func @transform_2(%arg0: i32, %arg1: i32) -> (i32, i32) {
    %c0_i32 = arith.constant 0 : i32
    %c0_i32_0 = arith.constant 0 : i32
    return %c0_i32, %arg1 : i32, i32
  }
  func.func @transform_3(%arg0: i32, %arg1: i32) -> (i32, i32) {
    %c0_i32 = arith.constant 0 : i32
    return %arg0, %arg1 : i32, i32
  }
}

</mosaic_0001>

<bundles_post_ra>
// kernel: tpu_custom_call.1
= control target key start
LH: loop header
LB: loop body
LE: loop exit
PB: predicated region body
PF: predicated region fallthrough
CT: control target
= control target key end

     0   :  { %8 = vsyncpa [#allocation3], 0  ;;  %s337_s0 = inlined_call_operand.hbm [shape: f32[16,32], index: 0, kind: input, shape index: {}]   ;;  %s338_s1 = inlined_call_operand.hbm [shape: f32[32,96], index: 1, kind: input, shape index: {}]   ;;  %s339_s2 = inlined_call_operand.vmem [shape: f32[1,96], index: 2, kind: input, shape index: {}]   ;;  %s340_s3 = inlined_call_operand.hbm [shape: f32[16,96], index: 3, kind: output, shape index: {}]  }
   0x1   :  { %9 = vsyncpa [#allocation6], 0 }
   0x2   :  { %10 = vsyncpa [#allocation4], 0  ;;  %s264_s12 = smov [#allocation2]   ;;  %s192_s16 = scalar_lea.hbm %s337_s0, 256 }
   0x3   :  { %s16_s13 = sshll.u32 %s264_s12, 4  ;;  %p193_p0 = scmp.ne.s32.totalorder %s337_s0, %s192_s16  ;;  %s17_s13 = int_to_ptr.vmem [resolvable:$true] %s16_s13 }
   0x4   :  { %p196_p1 = scmp.lt.u32.totalorder %s192_s16, %s337_s0 }
   0x6   :  { %p198_p2 = pnand %p196_p1, %p193_p0 }
   0x8   :  { %201 = shalt.err (!%p198_p2)
}
   0x9   :  { %s202_s21 = scalar_lea.vmem %s17_s13, 256  ;;  %p207_p4 = scmp.lt.s32.totalorder %s17_s13, %s17_s13 }
   0xa   :  { %p203_p3 = scmp.ne.s32.totalorder %s17_s13, %s202_s21  ;;  %p208_p5 = scmp.lt.s32.totalorder %s202_s21, %s202_s21 }
   0xc   :  { %p209_p6 = por %p208_p5, %p207_p4 }
   0xe   :  { %p210_p7 = pnand %p209_p6, %p203_p3 }
  0x10   :  { %213 = shalt.err (!%p210_p7)
}
  0x11   :  { %s265_s22 = smov 128   ;;  %s266_s23 = smov 8  }
  0x12   :  { %22 = dma.hbm_to_vmem [thread:$0]  %s337_s0, 256, %s17_s13, [#allocation3], %s265_s22, %s265_s22, %s266_s23  }
  0x13   :  { %s267_s26 = smov [#allocation5]   ;;  %s214_s30 = scalar_lea.hbm %s338_s1, 512 }
  0x14   :  { %s28_s27 = sshll.u32 %s267_s26, 4  ;;  %p215_p8 = scmp.ne.s32.totalorder %s338_s1, %s214_s30  ;;  %s29_s27 = int_to_ptr.vmem [resolvable:$true] %s28_s27 }
  0x15   :  { %p218_p9 = scmp.lt.u32.totalorder %s214_s30, %s338_s1 }
  0x17   :  { %p220_p10 = pnand %p218_p9, %p215_p8 }
  0x19   :  { %223 = shalt.err (!%p220_p10)
}
  0x1a   :  { %s224_s8 = scalar_lea.vmem %s29_s27, 512  ;;  %p229_p12 = scmp.lt.s32.totalorder %s29_s27, %s29_s27 }
  0x1b   :  { %p225_p11 = scmp.ne.s32.totalorder %s29_s27, %s224_s8  ;;  %p230_p13 = scmp.lt.s32.totalorder %s224_s8, %s224_s8 }
  0x1d   :  { %p231_p0 = por %p230_p13, %p229_p12 }
  0x1f   :  { %p232_p1 = pnand %p231_p0, %p225_p11 }
  0x21   :  { %235 = shalt.err (!%p232_p1)
}
  0x22   :  { %34 = dma.hbm_to_vmem [thread:$0]  %s338_s1, 512, %s29_s27, [#allocation6], %s265_s22, %s265_s22, %s266_s23  }
  0x23   :  { %258 = dma.done.wait [#allocation3], 256  }
  0x24   :  { %259 = vsyncadd [#allocation3], 4294967040 }
  0x25   :  { %260 = dma.done.wait [#allocation6], 512  }
  0x26   :  { %261 = vsyncadd [#allocation6], 4294966784  ;;  %vm56_vm0 = vcmask 261120   ;;  %v45_v0 = vld [vmem:[#allocation5] sm:$0xff]  ;;  %v46_v1 = vld [vmem:[#allocation5 + $0x8] sm:$0xff]  ;;  %s268_s11 = smov [#allocation7]  }
  0x27   :  { %v47_v2 = vld [vmem:[#allocation5 + $0x10] sm:$0xff]  ;;  %v179_v3 = vpack.c.bf16 %v46_v1, %v45_v0  ;;  %v48_v4 = vld [vmem:[#allocation5 + $0x18] sm:$0xff]  ;;  %s146_s12 = sshll.u32 %s268_s11, 4  ;;  %vm138_vm1 = vcmask 785408   ;;  %s147_s12 = int_to_ptr.vmem [resolvable:$true] %s146_s12 }
  0x28   :  { %v43_v5 = vld [vmem:[#allocation2] sm:$0xff]  ;;  %v183_v6 = vpack.c.bf16 %v48_v4, %v47_v2  ;;  %v44_v7 = vld [vmem:[#allocation2 + $0x8] sm:$0xff]  ;;  %s236_s13 = scalar_lea.vmem %s147_s12, 256  ;;  %p241_p3 = scmp.lt.s32.totalorder %s147_s12, %s147_s12 }
  0x29   :  { %176 = vmatprep.mubr.msk.f32.mxu0 %vm56_vm0, %v43_v5  ;;  %180 = vmatprep.subr.bf16.mxu0 %v179_v3  ;;  %v159_v8 = vld [vmem:[%s339_s2] ss:$0 sm:$0xff]  ;;  %p237_p2 = scmp.ne.s32.totalorder %s147_s12, %s236_s13  ;;  %p242_p4 = scmp.lt.s32.totalorder %s236_s13, %s236_s13 }
  0x2a   :  { %182 = vmatpush3.bf16.msra.mxu0 %v179_v3 }
  0x2b   :  { %184 = vmatprep.subr.bf16.mxu0 %v183_v6  ;;  %p243_p5 = por %p242_p4, %p241_p3 }
  0x2d   :  { %p244_p6 = pnand %p243_p5, %p237_p2 }
  0x2e   :  { %186 = vmatpush3.bf16.msra.mxu0 %v183_v6 }
  0x31   :  { %177 = vmatmul.mubr.msk.f32.vlgmr.msra.gmra.mrb[0].mxu0 %vm56_vm0, %v44_v7 }
 0x104   :  { %v178_v9 = vpop.f32.mrb[0].mxu0 }
 0x105   :  { %v135_v10 = vadd.f32 %v178_v9, %v159_v8  ;;  %v129_v11 = vpop.f32.mrb[1].mxu0 }
 0x106   :  { %v130_v12 = vadd.f32 %v159_v8, %v129_v11 }
 0x107   :  { %140 = vst.msk [vmem:[#allocation7 + $0x8] sm:$0xff] %vm138_vm1, %v135_v10 }
 0x108   :  { %139 = vst.msk [vmem:[#allocation7] sm:$0xff] %vm138_vm1, %v130_v12 }
 0x109   :  { %247 = shalt.err (!%p244_p6)
}
 0x10a   :  { %s248_s2 = scalar_lea.hbm %s340_s3, 256 }
 0x10b   :  { %p249_p7 = scmp.ne.s32.totalorder %s340_s3, %s248_s2  ;;  %p252_p8 = scmp.lt.u32.totalorder %s248_s2, %s340_s3 }
 0x10d   :  { %p254_p9 = pnand %p252_p8, %p249_p7 }
 0x10f   :  { %257 = shalt.err (!%p254_p9)
}
 0x110   :  { %152 = dma.vmem_to_hbm [thread:$0]  %s147_s12, 256, %s340_s3, [#allocation4], %s265_s22, %s265_s22, %s266_s23  }
 0x111   :  { %262 = dma.done.wait [#allocation4], 256  }
 0x112   :  { %263 = vsyncadd [#allocation4], 4294967040 }
 0x113   :  { %156 = vsyncpa [#allocation3], 1 }
 0x114   :  { %157 = vsyncpa [#allocation6], 1 }
 0x115   :  { %158 = vsyncpa [#allocation4], 1 }

</bundles_post_ra>
